<compile_context>
chip_gen: v5e
topology: v5e:2x2
jax: 0.10.0
libtpu: 0.0.40
codegen_flags: <defaults>
</compile_context>

<pallas_src>
import math

import jax
import jax.numpy as jnp
import numpy as np
from jax.experimental import pallas as pl
from jax.experimental.pallas import tpu as pltpu

# ---- module config: Bottle2neck(inplanes=32, planes=32, kernel_size=3, dilation=2, scale=4)
INPLANES = 32
PLANES = 32
KSIZE = 3
DILATION = 2
SCALE = 4
WIDTH = int(math.floor(PLANES / SCALE))      # 8
WS = WIDTH * SCALE                           # 32
NUMS = SCALE - 1                             # 3
NUM_PAD = math.floor(KSIZE / 2) * DILATION   # 2
SE_BOTTLENECK = 128
BN_EPS = 1e-5

B = 2
T = 16


def _bottle2neck_kernel(
    x_ref, w1_ref, b1_ref, bn1s_ref, bn1b_ref,
    wcf_ref, bc_ref, bncs_ref, bncb_ref,
    w3_ref, b3_ref, bn3s_ref, bn3b_ref,
    wse1_ref, bse1_ref, wse2_ref, bse2_ref,
    o_ref,
):
    # x_ref: [INPLANES, T] -- one example, PyTorch NCL layout with batch squeezed.
    x = x_ref[...].astype(jnp.float32)

    # conv1 (1x1) -> relu -> bn1 (eval-mode affine)
    out1 = jnp.dot(w1_ref[...], x, preferred_element_type=jnp.float32) + b1_ref[...]
    out1 = jnp.maximum(out1, 0.0)
    out1 = out1 * bn1s_ref[...] + bn1b_ref[...]                       # [WS, T]

    # Constant shift matrices for the 'same'-padded dilated conv taps:
    #   tap_j = sp @ S_j   with  tap_j[:, t] = sp[:, t + j*DILATION - NUM_PAD],
    # zero outside [0, T). Built once from iota; the shift runs on the idle MXU
    # instead of bouncing through a zero-padded VMEM scratch buffer.
    row = jax.lax.broadcasted_iota(jnp.int32, (T, T), 0)
    col = jax.lax.broadcasted_iota(jnp.int32, (T, T), 1)
    shift_mats = [
        jnp.where(row == col + (j * DILATION - NUM_PAD), 1.0, 0.0)
        for j in range(KSIZE)
    ]

    # Res2Net hierarchical branches -- everything stays in registers.
    branches = []
    sp = None
    for i in range(NUMS):
        chunk = out1[i * WIDTH:(i + 1) * WIDTH, :]                    # spx[i]
        sp = chunk if i == 0 else sp + chunk
        taps = []
        for j in range(KSIZE):
            s = j * DILATION - NUM_PAD                                # {-2, 0, +2}
            taps.append(
                sp if s == 0
                else jnp.dot(sp, shift_mats[j], preferred_element_type=jnp.float32))
        # Fused dilated conv: one [WIDTH, KSIZE*WIDTH] @ [KSIZE*WIDTH, T] matmul.
        sp_cat = jnp.concatenate(taps, axis=0)                        # [KSIZE*WIDTH, T]
        y = jnp.dot(wcf_ref[i], sp_cat, preferred_element_type=jnp.float32) + bc_ref[i]
        y = jnp.maximum(y, 0.0)                                       # relu
        sp = y * bncs_ref[i] + bncb_ref[i]                            # bn[i]
        branches.append(sp)
    branches.append(out1[NUMS * WIDTH:, :])                           # pass-through split
    cat = jnp.concatenate(branches, axis=0)                           # [WS, T], in registers

    # conv3 (1x1) -> relu -> bn3
    out3 = jnp.dot(w3_ref[...], cat, preferred_element_type=jnp.float32) + b3_ref[...]
    out3 = jnp.maximum(out3, 0.0)
    out3 = out3 * bn3s_ref[...] + bn3b_ref[...]                       # [PLANES, T]

    # SE module: global average over time -> 1x1 conv -> relu -> 1x1 conv -> sigmoid.
    # The time-mean is broadcast back to T columns so both SE matmuls keep an
    # ordinary N=T shape (every column carries the identical gate value).
    m = jnp.mean(out3, axis=1, keepdims=True)                         # [PLANES, 1]
    m = jnp.broadcast_to(m, (PLANES, T))                              # [PLANES, T]
    h = jnp.dot(wse1_ref[...], m, preferred_element_type=jnp.float32) + bse1_ref[...]
    h = jnp.maximum(h, 0.0)                                           # [SE_BOTTLENECK, T]
    g = jax.nn.sigmoid(
        jnp.dot(wse2_ref[...], h, preferred_element_type=jnp.float32) + bse2_ref[...])
    out3 = out3 * g

    # residual add
    o_ref[...] = (out3 + x).astype(o_ref.dtype)


def bottle2neck_forward(x_ncl, params):
    """x_ncl: [B, C, T] (PyTorch Conv1d layout). Returns [B, C, T]."""
    (w1, b1, bn1s, bn1b, wc, bc, bncs, bncb,
     w3, b3, bn3s, bn3b, wse1, bse1, wse2, bse2) = params

    # One-time weight prep outside the kernel's hot path:
    #  * fuse the KSIZE dilated-conv taps: wcf[i, o, j*WIDTH + c] = wc[i, o, c, j]
    #  * reshape biases / folded-BN affines to column vectors [C, 1] so they
    #    broadcast along the time (lane) axis inside the kernel.
    col = lambda v: v[..., None]
    wcf = jnp.transpose(wc, (0, 1, 3, 2)).reshape(NUMS, WIDTH, KSIZE * WIDTH)
    prep = (w1, col(b1), col(bn1s), col(bn1b),
            wcf, col(bc), col(bncs), col(bncb),
            w3, col(b3), col(bn3s), col(bn3b),
            wse1, col(bse1), wse2, col(bse2))

    def full_spec(arr):
        nd = arr.ndim
        return pl.BlockSpec(arr.shape, lambda b, nd=nd: (0,) * nd)

    bsz = x_ncl.shape[0]
    in_specs = [pl.BlockSpec((None, INPLANES, T), lambda b: (b, 0, 0))] + \
               [full_spec(p) for p in prep]

    return pl.pallas_call(
        _bottle2neck_kernel,
        out_shape=jax.ShapeDtypeStruct((bsz, PLANES, T), x_ncl.dtype),
        grid_spec=pltpu.PrefetchScalarGridSpec(
            num_scalar_prefetch=0,
            grid=(bsz,),            # one example per step; "parallel" -> one example
            in_specs=in_specs,      # per TensorCore on dual-TC chips; weight blocks
            out_specs=pl.BlockSpec((None, PLANES, T), lambda b: (b, 0, 0)),
        ),                          # have constant block indices -> DMA'd once.
        compiler_params=pltpu.CompilerParams(dimension_semantics=("parallel",)),
    )(x_ncl, *prep)


# ----------------------------- parameter init -------------------------------
def _bn_affine(key, shape):
    kg, kb, km, kv = jax.random.split(key, 4)
    gamma = 1.0 + 0.1 * jax.random.normal(kg, shape, jnp.float32)
    beta = 0.1 * jax.random.normal(kb, shape, jnp.float32)
    mean = 0.1 * jax.random.normal(km, shape, jnp.float32)
    var = jnp.abs(jax.random.normal(kv, shape, jnp.float32)) + 0.5
    scale = gamma / jnp.sqrt(var + BN_EPS)
    bias = beta - mean * scale
    return scale, bias


def init_params(key):
    ks = jax.random.split(key, 12)
    nrm = lambda k, shape: 0.1 * jax.random.normal(k, shape, jnp.float32)

    w1 = nrm(ks[0], (WS, INPLANES))                 # conv1 1x1, [out, in]
    b1 = nrm(ks[1], (WS,))
    bn1s, bn1b = _bn_affine(ks[2], (WS,))

    # dilated convs: PyTorch layout [out, in, k] per branch
    wc = nrm(ks[3], (NUMS, WIDTH, WIDTH, KSIZE))
    bc = nrm(ks[4], (NUMS, WIDTH))
    bncs, bncb = _bn_affine(ks[5], (NUMS, WIDTH))

    w3 = nrm(ks[6], (PLANES, WS))                   # conv3 1x1
    b3 = nrm(ks[7], (PLANES,))
    bn3s, bn3b = _bn_affine(ks[8], (PLANES,))

    wse1 = nrm(ks[9], (SE_BOTTLENECK, PLANES))      # SE squeeze
    bse1 = nrm(ks[10], (SE_BOTTLENECK,))
    wse2 = nrm(ks[11], (PLANES, SE_BOTTLENECK))     # SE excite
    bse2 = 0.1 * jax.random.normal(jax.random.fold_in(key, 99), (PLANES,), jnp.float32)

    return (w1, b1, bn1s, bn1b, wc, bc, bncs, bncb,
            w3, b3, bn3s, bn3b, wse1, bse1, wse2, bse2)


# ----------------------------- pure-JAX reference ---------------------------
def reference_forward(x, params):
    (w1, b1, bn1s, bn1b, wc, bc, bncs, bncb,
     w3, b3, bn3s, bn3b, wse1, bse1, wse2, bse2) = params
    cn = lambda v: v[None, :, None]                               # [C] -> [1, C, 1]

    out = jnp.einsum('oc,bct->bot', w1, x) + cn(b1)
    out = jnp.maximum(out, 0.0) * cn(bn1s) + cn(bn1b)
    branches = []
    sp = None
    for i in range(NUMS):
        c = out[:, i * WIDTH:(i + 1) * WIDTH, :]
        sp = c if i == 0 else sp + c
        xp = jnp.pad(sp, ((0, 0), (0, 0), (NUM_PAD, NUM_PAD)))
        y = sum(jnp.einsum('oc,bct->bot', wc[i, :, :, j],
                           xp[:, :, j * DILATION:j * DILATION + T])
                for j in range(KSIZE)) + cn(bc[i])
        sp = jnp.maximum(y, 0.0) * cn(bncs[i]) + cn(bncb[i])
        branches.append(sp)
    branches.append(out[:, NUMS * WIDTH:, :])
    cat = jnp.concatenate(branches, axis=1)

    out3 = jnp.maximum(jnp.einsum('oc,bct->bot', w3, cat) + cn(b3), 0.0)
    out3 = out3 * cn(bn3s) + cn(bn3b)

    m = jnp.mean(out3, axis=2, keepdims=True)
    h = jnp.maximum(jnp.einsum('oc,bcx->box', wse1, m) + cn(bse1), 0.0)
    g = jax.nn.sigmoid(jnp.einsum('oc,bcx->box', wse2, h) + cn(bse2))
    return out3 * g + x


if __name__ == "__main__":
    key = jax.random.PRNGKey(0)
    kx, kp = jax.random.split(key)
    x = jax.random.normal(kx, (B, INPLANES, T), jnp.float32)   # PyTorch-style [B, C, T]
    params = init_params(kp)

    out = bottle2neck_forward(x, params)
    out = jax.block_until_ready(out)

    ref = reference_forward(x, params)
    np.testing.assert_allclose(np.asarray(out), np.asarray(ref), rtol=1e-4, atol=1e-4)

    assert out.shape == (B, PLANES, T)
    print("KERNEL_OK")
</pallas_src>

<mosaic_0001>
module attributes {stable_mosaic.version = 11 : i64} {
  func.func @_bottle2neck_kernel(%arg0: i32, %arg1: memref<1x32x16xf32, #tpu.memory_space<vmem>>, %arg2: memref<32x32xf32, #tpu.memory_space<vmem>>, %arg3: memref<32x1xf32, #tpu.memory_space<vmem>>, %arg4: memref<32x1xf32, #tpu.memory_space<vmem>>, %arg5: memref<32x1xf32, #tpu.memory_space<vmem>>, %arg6: memref<3x8x24xf32, #tpu.memory_space<vmem>>, %arg7: memref<3x8x1xf32, #tpu.memory_space<vmem>>, %arg8: memref<3x8x1xf32, #tpu.memory_space<vmem>>, %arg9: memref<3x8x1xf32, #tpu.memory_space<vmem>>, %arg10: memref<32x32xf32, #tpu.memory_space<vmem>>, %arg11: memref<32x1xf32, #tpu.memory_space<vmem>>, %arg12: memref<32x1xf32, #tpu.memory_space<vmem>>, %arg13: memref<32x1xf32, #tpu.memory_space<vmem>>, %arg14: memref<128x32xf32, #tpu.memory_space<vmem>>, %arg15: memref<128x1xf32, #tpu.memory_space<vmem>>, %arg16: memref<32x128xf32, #tpu.memory_space<vmem>>, %arg17: memref<32x1xf32, #tpu.memory_space<vmem>>, %arg18: memref<1x32x16xf32, #tpu.memory_space<vmem>>) attributes {dimension_semantics = [#tpu.dimension_semantics<parallel>], iteration_bounds = array<i64: 2>, scalar_prefetch = 0 : i64, scratch_operands = 0 : i64, tpu.core_type = #tpu.core_type<tc>, window_params = [{transform_indices = @transform_0, window_bounds = array<i64: 1, 32, 16>}, {pipeline_mode = #tpu.pipeline_mode<synchronous>, transform_indices = @transform_1, window_bounds = array<i64: 32, 32>}, {pipeline_mode = #tpu.pipeline_mode<synchronous>, transform_indices = @transform_2, window_bounds = array<i64: 32, 1>}, {pipeline_mode = #tpu.pipeline_mode<synchronous>, transform_indices = @transform_3, window_bounds = array<i64: 32, 1>}, {pipeline_mode = #tpu.pipeline_mode<synchronous>, transform_indices = @transform_4, window_bounds = array<i64: 32, 1>}, {pipeline_mode = #tpu.pipeline_mode<synchronous>, transform_indices = @transform_5, window_bounds = array<i64: 3, 8, 24>}, {pipeline_mode = #tpu.pipeline_mode<synchronous>, transform_indices = @transform_6, window_bounds = array<i64: 3, 8, 1>}, {pipeline_mode = #tpu.pipeline_mode<synchronous>, transform_indices = @transform_7, window_bounds = array<i64: 3, 8, 1>}, {pipeline_mode = #tpu.pipeline_mode<synchronous>, transform_indices = @transform_8, window_bounds = array<i64: 3, 8, 1>}, {pipeline_mode = #tpu.pipeline_mode<synchronous>, transform_indices = @transform_9, window_bounds = array<i64: 32, 32>}, {pipeline_mode = #tpu.pipeline_mode<synchronous>, transform_indices = @transform_10, window_bounds = array<i64: 32, 1>}, {pipeline_mode = #tpu.pipeline_mode<synchronous>, transform_indices = @transform_11, window_bounds = array<i64: 32, 1>}, {pipeline_mode = #tpu.pipeline_mode<synchronous>, transform_indices = @transform_12, window_bounds = array<i64: 32, 1>}, {pipeline_mode = #tpu.pipeline_mode<synchronous>, transform_indices = @transform_13, window_bounds = array<i64: 128, 32>}, {pipeline_mode = #tpu.pipeline_mode<synchronous>, transform_indices = @transform_14, window_bounds = array<i64: 128, 1>}, {pipeline_mode = #tpu.pipeline_mode<synchronous>, transform_indices = @transform_15, window_bounds = array<i64: 32, 128>}, {pipeline_mode = #tpu.pipeline_mode<synchronous>, transform_indices = @transform_16, window_bounds = array<i64: 32, 1>}, {transform_indices = @transform_17, window_bounds = array<i64: 1, 32, 16>}]} {
    %c0 = arith.constant 0 : index
    %c0_0 = arith.constant 0 : index
    %c0_1 = arith.constant 0 : index
    %0 = vector.load %arg1[%c0, %c0_0, %c0_1] : memref<1x32x16xf32, #tpu.memory_space<vmem>>, vector<1x32x16xf32>
    %1 = vector.shape_cast %0 : vector<1x32x16xf32> to vector<32x16xf32>
    %c0_2 = arith.constant 0 : index
    %c0_3 = arith.constant 0 : index
    %2 = vector.load %arg2[%c0_2, %c0_3] : memref<32x32xf32, #tpu.memory_space<vmem>>, vector<32x32xf32>
    %cst = arith.constant dense<0.000000e+00> : vector<32x16xf32>
    %3 = tpu.matmul %2, %1, %cst {dimension_numbers = #tpu.dot_dimension_numbers<[1], [0], [0], [1], [0, 0, 1, 1], [], []>} : vector<32x32xf32>, vector<32x16xf32>, vector<32x16xf32> -> vector<32x16xf32>
    %c0_4 = arith.constant 0 : index
    %c0_5 = arith.constant 0 : index
    %4 = vector.load %arg3[%c0_4, %c0_5] : memref<32x1xf32, #tpu.memory_space<vmem>>, vector<32x1xf32>
    %5 = vector.broadcast %4 : vector<32x1xf32> to vector<32x16xf32>
    %6 = arith.addf %3, %5 : vector<32x16xf32>
    %cst_6 = arith.constant 0.000000e+00 : f32
    %7 = vector.broadcast %cst_6 : f32 to vector<32x16xf32>
    %8 = arith.maximumf %6, %7 : vector<32x16xf32>
    %c0_7 = arith.constant 0 : index
    %c0_8 = arith.constant 0 : index
    %9 = vector.load %arg4[%c0_7, %c0_8] : memref<32x1xf32, #tpu.memory_space<vmem>>, vector<32x1xf32>
    %10 = vector.broadcast %9 : vector<32x1xf32> to vector<32x16xf32>
    %11 = arith.mulf %8, %10 : vector<32x16xf32>
    %c0_9 = arith.constant 0 : index
    %c0_10 = arith.constant 0 : index
    %12 = vector.load %arg5[%c0_9, %c0_10] : memref<32x1xf32, #tpu.memory_space<vmem>>, vector<32x1xf32>
    %13 = vector.broadcast %12 : vector<32x1xf32> to vector<32x16xf32>
    %14 = arith.addf %11, %13 : vector<32x16xf32>
    %15 = tpu.iota {dimensions = array<i32: 0>} : vector<16x16xi32>
    %16 = tpu.iota {dimensions = array<i32: 1>} : vector<16x16xi32>
    %c-2_i32 = arith.constant -2 : i32
    %17 = vector.broadcast %c-2_i32 : i32 to vector<16x16xi32>
    %18 = arith.addi %16, %17 : vector<16x16xi32>
    %19 = arith.cmpi eq, %15, %18 : vector<16x16xi32>
    %cst_11 = arith.constant 1.000000e+00 : f32
    %cst_12 = arith.constant 0.000000e+00 : f32
    %20 = vector.broadcast %cst_11 : f32 to vector<16x16xf32>
    %21 = vector.broadcast %cst_12 : f32 to vector<16x16xf32>
    %22 = arith.select %19, %20, %21 : vector<16x16xi1>, vector<16x16xf32>
    %c2_i32 = arith.constant 2 : i32
    %23 = vector.broadcast %c2_i32 : i32 to vector<16x16xi32>
    %24 = arith.addi %16, %23 : vector<16x16xi32>
    %25 = arith.cmpi eq, %15, %24 : vector<16x16xi32>
    %cst_13 = arith.constant 1.000000e+00 : f32
    %cst_14 = arith.constant 0.000000e+00 : f32
    %26 = vector.broadcast %cst_13 : f32 to vector<16x16xf32>
    %27 = vector.broadcast %cst_14 : f32 to vector<16x16xf32>
    %28 = arith.select %25, %26, %27 : vector<16x16xi1>, vector<16x16xf32>
    %29 = vector.extract_strided_slice %14 {offsets = [0, 0], sizes = [8, 16], strides = [1, 1]} : vector<32x16xf32> to vector<8x16xf32>
    %cst_15 = arith.constant dense<0.000000e+00> : vector<8x16xf32>
    %30 = tpu.matmul %29, %22, %cst_15 {dimension_numbers = #tpu.dot_dimension_numbers<[1], [0], [0], [1], [0, 0, 1, 1], [], []>} : vector<8x16xf32>, vector<16x16xf32>, vector<8x16xf32> -> vector<8x16xf32>
    %cst_16 = arith.constant dense<0.000000e+00> : vector<8x16xf32>
    %31 = tpu.matmul %29, %28, %cst_16 {dimension_numbers = #tpu.dot_dimension_numbers<[1], [0], [0], [1], [0, 0, 1, 1], [], []>} : vector<8x16xf32>, vector<16x16xf32>, vector<8x16xf32> -> vector<8x16xf32>
    %32 = tpu.concatenate %30, %29, %31 in 0 : vector<8x16xf32>, vector<8x16xf32>, vector<8x16xf32> -> vector<24x16xf32>
    %c0_17 = arith.constant 0 : index
    %c0_18 = arith.constant 0 : index
    %c0_19 = arith.constant 0 : index
    %33 = vector.load %arg6[%c0_17, %c0_18, %c0_19] : memref<3x8x24xf32, #tpu.memory_space<vmem>>, vector<1x8x24xf32>
    %34 = vector.shape_cast %33 : vector<1x8x24xf32> to vector<8x24xf32>
    %cst_20 = arith.constant dense<0.000000e+00> : vector<8x16xf32>
    %35 = tpu.matmul %34, %32, %cst_20 {dimension_numbers = #tpu.dot_dimension_numbers<[1], [0], [0], [1], [0, 0, 1, 1], [], []>} : vector<8x24xf32>, vector<24x16xf32>, vector<8x16xf32> -> vector<8x16xf32>
    %c0_21 = arith.constant 0 : index
    %c0_22 = arith.constant 0 : index
    %c0_23 = arith.constant 0 : index
    %36 = vector.load %arg7[%c0_21, %c0_22, %c0_23] : memref<3x8x1xf32, #tpu.memory_space<vmem>>, vector<1x8x1xf32>
    %37 = vector.shape_cast %36 : vector<1x8x1xf32> to vector<8x1xf32>
    %38 = vector.broadcast %37 : vector<8x1xf32> to vector<8x16xf32>
    %39 = arith.addf %35, %38 : vector<8x16xf32>
    %cst_24 = arith.constant 0.000000e+00 : f32
    %40 = vector.broadcast %cst_24 : f32 to vector<8x16xf32>
    %41 = arith.maximumf %39, %40 : vector<8x16xf32>
    %c0_25 = arith.constant 0 : index
    %c0_26 = arith.constant 0 : index
    %c0_27 = arith.constant 0 : index
    %42 = vector.load %arg8[%c0_25, %c0_26, %c0_27] : memref<3x8x1xf32, #tpu.memory_space<vmem>>, vector<1x8x1xf32>
    %43 = vector.shape_cast %42 : vector<1x8x1xf32> to vector<8x1xf32>
    %44 = vector.broadcast %43 : vector<8x1xf32> to vector<8x16xf32>
    %45 = arith.mulf %41, %44 : vector<8x16xf32>
    %c0_28 = arith.constant 0 : index
    %c0_29 = arith.constant 0 : index
    %c0_30 = arith.constant 0 : index
    %46 = vector.load %arg9[%c0_28, %c0_29, %c0_30] : memref<3x8x1xf32, #tpu.memory_space<vmem>>, vector<1x8x1xf32>
    %47 = vector.shape_cast %46 : vector<1x8x1xf32> to vector<8x1xf32>
    %48 = vector.broadcast %47 : vector<8x1xf32> to vector<8x16xf32>
    %49 = arith.addf %45, %48 : vector<8x16xf32>
    %50 = vector.extract_strided_slice %14 {offsets = [8, 0], sizes = [8, 16], strides = [1, 1]} : vector<32x16xf32> to vector<8x16xf32>
    %51 = arith.addf %49, %50 : vector<8x16xf32>
    %cst_31 = arith.constant dense<0.000000e+00> : vector<8x16xf32>
    %52 = tpu.matmul %51, %22, %cst_31 {dimension_numbers = #tpu.dot_dimension_numbers<[1], [0], [0], [1], [0, 0, 1, 1], [], []>} : vector<8x16xf32>, vector<16x16xf32>, vector<8x16xf32> -> vector<8x16xf32>
    %cst_32 = arith.constant dense<0.000000e+00> : vector<8x16xf32>
    %53 = tpu.matmul %51, %28, %cst_32 {dimension_numbers = #tpu.dot_dimension_numbers<[1], [0], [0], [1], [0, 0, 1, 1], [], []>} : vector<8x16xf32>, vector<16x16xf32>, vector<8x16xf32> -> vector<8x16xf32>
    %54 = tpu.concatenate %52, %51, %53 in 0 : vector<8x16xf32>, vector<8x16xf32>, vector<8x16xf32> -> vector<24x16xf32>
    %c1 = arith.constant 1 : index
    %c0_33 = arith.constant 0 : index
    %c0_34 = arith.constant 0 : index
    %55 = vector.load %arg6[%c1, %c0_33, %c0_34] : memref<3x8x24xf32, #tpu.memory_space<vmem>>, vector<1x8x24xf32>
    %56 = vector.shape_cast %55 : vector<1x8x24xf32> to vector<8x24xf32>
    %cst_35 = arith.constant dense<0.000000e+00> : vector<8x16xf32>
    %57 = tpu.matmul %56, %54, %cst_35 {dimension_numbers = #tpu.dot_dimension_numbers<[1], [0], [0], [1], [0, 0, 1, 1], [], []>} : vector<8x24xf32>, vector<24x16xf32>, vector<8x16xf32> -> vector<8x16xf32>
    %c1_36 = arith.constant 1 : index
    %c0_37 = arith.constant 0 : index
    %c0_38 = arith.constant 0 : index
    %58 = vector.load %arg7[%c1_36, %c0_37, %c0_38] : memref<3x8x1xf32, #tpu.memory_space<vmem>>, vector<1x8x1xf32>
    %59 = vector.shape_cast %58 : vector<1x8x1xf32> to vector<8x1xf32>
    %60 = vector.broadcast %59 : vector<8x1xf32> to vector<8x16xf32>
    %61 = arith.addf %57, %60 : vector<8x16xf32>
    %cst_39 = arith.constant 0.000000e+00 : f32
    %62 = vector.broadcast %cst_39 : f32 to vector<8x16xf32>
    %63 = arith.maximumf %61, %62 : vector<8x16xf32>
    %c1_40 = arith.constant 1 : index
    %c0_41 = arith.constant 0 : index
    %c0_42 = arith.constant 0 : index
    %64 = vector.load %arg8[%c1_40, %c0_41, %c0_42] : memref<3x8x1xf32, #tpu.memory_space<vmem>>, vector<1x8x1xf32>
    %65 = vector.shape_cast %64 : vector<1x8x1xf32> to vector<8x1xf32>
    %66 = vector.broadcast %65 : vector<8x1xf32> to vector<8x16xf32>
    %67 = arith.mulf %63, %66 : vector<8x16xf32>
    %c1_43 = arith.constant 1 : index
    %c0_44 = arith.constant 0 : index
    %c0_45 = arith.constant 0 : index
    %68 = vector.load %arg9[%c1_43, %c0_44, %c0_45] : memref<3x8x1xf32, #tpu.memory_space<vmem>>, vector<1x8x1xf32>
    %69 = vector.shape_cast %68 : vector<1x8x1xf32> to vector<8x1xf32>
    %70 = vector.broadcast %69 : vector<8x1xf32> to vector<8x16xf32>
    %71 = arith.addf %67, %70 : vector<8x16xf32>
    %72 = vector.extract_strided_slice %14 {offsets = [16, 0], sizes = [8, 16], strides = [1, 1]} : vector<32x16xf32> to vector<8x16xf32>
    %73 = arith.addf %71, %72 : vector<8x16xf32>
    %cst_46 = arith.constant dense<0.000000e+00> : vector<8x16xf32>
    %74 = tpu.matmul %73, %22, %cst_46 {dimension_numbers = #tpu.dot_dimension_numbers<[1], [0], [0], [1], [0, 0, 1, 1], [], []>} : vector<8x16xf32>, vector<16x16xf32>, vector<8x16xf32> -> vector<8x16xf32>
    %cst_47 = arith.constant dense<0.000000e+00> : vector<8x16xf32>
    %75 = tpu.matmul %73, %28, %cst_47 {dimension_numbers = #tpu.dot_dimension_numbers<[1], [0], [0], [1], [0, 0, 1, 1], [], []>} : vector<8x16xf32>, vector<16x16xf32>, vector<8x16xf32> -> vector<8x16xf32>
    %76 = tpu.concatenate %74, %73, %75 in 0 : vector<8x16xf32>, vector<8x16xf32>, vector<8x16xf32> -> vector<24x16xf32>
    %c2 = arith.constant 2 : index
    %c0_48 = arith.constant 0 : index
    %c0_49 = arith.constant 0 : index
    %77 = vector.load %arg6[%c2, %c0_48, %c0_49] : memref<3x8x24xf32, #tpu.memory_space<vmem>>, vector<1x8x24xf32>
    %78 = vector.shape_cast %77 : vector<1x8x24xf32> to vector<8x24xf32>
    %cst_50 = arith.constant dense<0.000000e+00> : vector<8x16xf32>
    %79 = tpu.matmul %78, %76, %cst_50 {dimension_numbers = #tpu.dot_dimension_numbers<[1], [0], [0], [1], [0, 0, 1, 1], [], []>} : vector<8x24xf32>, vector<24x16xf32>, vector<8x16xf32> -> vector<8x16xf32>
    %c2_51 = arith.constant 2 : index
    %c0_52 = arith.constant 0 : index
    %c0_53 = arith.constant 0 : index
    %80 = vector.load %arg7[%c2_51, %c0_52, %c0_53] : memref<3x8x1xf32, #tpu.memory_space<vmem>>, vector<1x8x1xf32>
    %81 = vector.shape_cast %80 : vector<1x8x1xf32> to vector<8x1xf32>
    %82 = vector.broadcast %81 : vector<8x1xf32> to vector<8x16xf32>
    %83 = arith.addf %79, %82 : vector<8x16xf32>
    %cst_54 = arith.constant 0.000000e+00 : f32
    %84 = vector.broadcast %cst_54 : f32 to vector<8x16xf32>
    %85 = arith.maximumf %83, %84 : vector<8x16xf32>
    %c2_55 = arith.constant 2 : index
    %c0_56 = arith.constant 0 : index
    %c0_57 = arith.constant 0 : index
    %86 = vector.load %arg8[%c2_55, %c0_56, %c0_57] : memref<3x8x1xf32, #tpu.memory_space<vmem>>, vector<1x8x1xf32>
    %87 = vector.shape_cast %86 : vector<1x8x1xf32> to vector<8x1xf32>
    %88 = vector.broadcast %87 : vector<8x1xf32> to vector<8x16xf32>
    %89 = arith.mulf %85, %88 : vector<8x16xf32>
    %c2_58 = arith.constant 2 : index
    %c0_59 = arith.constant 0 : index
    %c0_60 = arith.constant 0 : index
    %90 = vector.load %arg9[%c2_58, %c0_59, %c0_60] : memref<3x8x1xf32, #tpu.memory_space<vmem>>, vector<1x8x1xf32>
    %91 = vector.shape_cast %90 : vector<1x8x1xf32> to vector<8x1xf32>
    %92 = vector.broadcast %91 : vector<8x1xf32> to vector<8x16xf32>
    %93 = arith.addf %89, %92 : vector<8x16xf32>
    %94 = vector.extract_strided_slice %14 {offsets = [24, 0], sizes = [8, 16], strides = [1, 1]} : vector<32x16xf32> to vector<8x16xf32>
    %95 = tpu.concatenate %49, %71, %93, %94 in 0 : vector<8x16xf32>, vector<8x16xf32>, vector<8x16xf32>, vector<8x16xf32> -> vector<32x16xf32>
    %c0_61 = arith.constant 0 : index
    %c0_62 = arith.constant 0 : index
    %96 = vector.load %arg10[%c0_61, %c0_62] : memref<32x32xf32, #tpu.memory_space<vmem>>, vector<32x32xf32>
    %cst_63 = arith.constant dense<0.000000e+00> : vector<32x16xf32>
    %97 = tpu.matmul %96, %95, %cst_63 {dimension_numbers = #tpu.dot_dimension_numbers<[1], [0], [0], [1], [0, 0, 1, 1], [], []>} : vector<32x32xf32>, vector<32x16xf32>, vector<32x16xf32> -> vector<32x16xf32>
    %c0_64 = arith.constant 0 : index
    %c0_65 = arith.constant 0 : index
    %98 = vector.load %arg11[%c0_64, %c0_65] : memref<32x1xf32, #tpu.memory_space<vmem>>, vector<32x1xf32>
    %99 = vector.broadcast %98 : vector<32x1xf32> to vector<32x16xf32>
    %100 = arith.addf %97, %99 : vector<32x16xf32>
    %cst_66 = arith.constant 0.000000e+00 : f32
    %101 = vector.broadcast %cst_66 : f32 to vector<32x16xf32>
    %102 = arith.maximumf %100, %101 : vector<32x16xf32>
    %c0_67 = arith.constant 0 : index
    %c0_68 = arith.constant 0 : index
    %103 = vector.load %arg12[%c0_67, %c0_68] : memref<32x1xf32, #tpu.memory_space<vmem>>, vector<32x1xf32>
    %104 = vector.broadcast %103 : vector<32x1xf32> to vector<32x16xf32>
    %105 = arith.mulf %102, %104 : vector<32x16xf32>
    %c0_69 = arith.constant 0 : index
    %c0_70 = arith.constant 0 : index
    %106 = vector.load %arg13[%c0_69, %c0_70] : memref<32x1xf32, #tpu.memory_space<vmem>>, vector<32x1xf32>
    %107 = vector.broadcast %106 : vector<32x1xf32> to vector<32x16xf32>
    %108 = arith.addf %105, %107 : vector<32x16xf32>
    %cst_71 = arith.constant dense<0.000000e+00> : vector<32xf32>
    %109 = vector.multi_reduction <add>, %108, %cst_71 [1] : vector<32x16xf32> to vector<32xf32>
    %110 = vector.shape_cast %109 : vector<32xf32> to vector<32x1xf32>
    %cst_72 = arith.constant 1.600000e+01 : f32
    %111 = vector.broadcast %cst_72 : f32 to vector<32x1xf32>
    %112 = arith.divf %110, %111 : vector<32x1xf32>
    %113 = vector.shape_cast %112 : vector<32x1xf32> to vector<32x1xf32>
    %114 = vector.broadcast %113 : vector<32x1xf32> to vector<32x16xf32>
    %c0_73 = arith.constant 0 : index
    %c0_74 = arith.constant 0 : index
    %115 = vector.load %arg14[%c0_73, %c0_74] : memref<128x32xf32, #tpu.memory_space<vmem>>, vector<128x32xf32>
    %cst_75 = arith.constant dense<0.000000e+00> : vector<128x16xf32>
    %116 = tpu.matmul %115, %114, %cst_75 {dimension_numbers = #tpu.dot_dimension_numbers<[1], [0], [0], [1], [0, 0, 1, 1], [], []>} : vector<128x32xf32>, vector<32x16xf32>, vector<128x16xf32> -> vector<128x16xf32>
    %c0_76 = arith.constant 0 : index
    %c0_77 = arith.constant 0 : index
    %117 = vector.load %arg15[%c0_76, %c0_77] : memref<128x1xf32, #tpu.memory_space<vmem>>, vector<128x1xf32>
    %118 = vector.broadcast %117 : vector<128x1xf32> to vector<128x16xf32>
    %119 = arith.addf %116, %118 : vector<128x16xf32>
    %cst_78 = arith.constant 0.000000e+00 : f32
    %120 = vector.broadcast %cst_78 : f32 to vector<128x16xf32>
    %121 = arith.maximumf %119, %120 : vector<128x16xf32>
    %c0_79 = arith.constant 0 : index
    %c0_80 = arith.constant 0 : index
    %122 = vector.load %arg16[%c0_79, %c0_80] : memref<32x128xf32, #tpu.memory_space<vmem>>, vector<32x128xf32>
    %cst_81 = arith.constant dense<0.000000e+00> : vector<32x16xf32>
    %123 = tpu.matmul %122, %121, %cst_81 {dimension_numbers = #tpu.dot_dimension_numbers<[1], [0], [0], [1], [0, 0, 1, 1], [], []>} : vector<32x128xf32>, vector<128x16xf32>, vector<32x16xf32> -> vector<32x16xf32>
    %c0_82 = arith.constant 0 : index
    %c0_83 = arith.constant 0 : index
    %124 = vector.load %arg17[%c0_82, %c0_83] : memref<32x1xf32, #tpu.memory_space<vmem>>, vector<32x1xf32>
    %125 = vector.broadcast %124 : vector<32x1xf32> to vector<32x16xf32>
    %126 = arith.addf %123, %125 : vector<32x16xf32>
    %127 = arith.negf %126 : vector<32x16xf32>
    %128 = math.exp %127 : vector<32x16xf32>
    %cst_84 = arith.constant 1.000000e+00 : f32
    %129 = vector.broadcast %cst_84 : f32 to vector<32x16xf32>
    %130 = arith.addf %129, %128 : vector<32x16xf32>
    %131 = arith.divf %129, %130 : vector<32x16xf32>
    %132 = arith.mulf %108, %131 : vector<32x16xf32>
    %133 = arith.addf %132, %1 : vector<32x16xf32>
    %c0_85 = arith.constant 0 : index
    %c0_86 = arith.constant 0 : index
    %c0_87 = arith.constant 0 : index
    %134 = vector.load %arg18[%c0_85, %c0_86, %c0_87] : memref<1x32x16xf32, #tpu.memory_space<vmem>>, vector<1x32x16xf32>
    %135 = vector.shape_cast %134 : vector<1x32x16xf32> to vector<32x16xf32>
    %136 = vector.shape_cast %133 : vector<32x16xf32> to vector<1x32x16xf32>
    tpu.vector_store %arg18[%c0_85, %c0_86, %c0_87], %136 {strides = array<i32>} : memref<1x32x16xf32, #tpu.memory_space<vmem>>, vector<1x32x16xf32>,
    return
  }
  func.func @transform_0(%arg0: i32) -> (i32, i32, i32) {
    %c0_i32 = arith.constant 0 : i32
    %c0_i32_0 = arith.constant 0 : i32
    %c0_i32_1 = arith.constant 0 : i32
    return %arg0, %c0_i32, %c0_i32_0 : i32, i32, i32
  }
  func.func @transform_1(%arg0: i32) -> (i32, i32) {
    %c0_i32 = arith.constant 0 : i32
    %c0_i32_0 = arith.constant 0 : i32
    %c0_i32_1 = arith.constant 0 : i32
    return %c0_i32, %c0_i32_0 : i32, i32
  }
  func.func @transform_2(%arg0: i32) -> (i32, i32) {
    %c0_i32 = arith.constant 0 : i32
    %c0_i32_0 = arith.constant 0 : i32
    %c0_i32_1 = arith.constant 0 : i32
    return %c0_i32, %c0_i32_0 : i32, i32
  }
  func.func @transform_3(%arg0: i32) -> (i32, i32) {
    %c0_i32 = arith.constant 0 : i32
    %c0_i32_0 = arith.constant 0 : i32
    %c0_i32_1 = arith.constant 0 : i32
    return %c0_i32, %c0_i32_0 : i32, i32
  }
  func.func @transform_4(%arg0: i32) -> (i32, i32) {
    %c0_i32 = arith.constant 0 : i32
    %c0_i32_0 = arith.constant 0 : i32
    %c0_i32_1 = arith.constant 0 : i32
    return %c0_i32, %c0_i32_0 : i32, i32
  }
  func.func @transform_5(%arg0: i32) -> (i32, i32, i32) {
    %c0_i32 = arith.constant 0 : i32
    %c0_i32_0 = arith.constant 0 : i32
    %c0_i32_1 = arith.constant 0 : i32
    %c0_i32_2 = arith.constant 0 : i32
    return %c0_i32, %c0_i32_0, %c0_i32_1 : i32, i32, i32
  }
  func.func @transform_6(%arg0: i32) -> (i32, i32, i32) {
    %c0_i32 = arith.constant 0 : i32
    %c0_i32_0 = arith.constant 0 : i32
    %c0_i32_1 = arith.constant 0 : i32
    %c0_i32_2 = arith.constant 0 : i32
    return %c0_i32, %c0_i32_0, %c0_i32_1 : i32, i32, i32
  }
  func.func @transform_7(%arg0: i32) -> (i32, i32, i32) {
    %c0_i32 = arith.constant 0 : i32
    %c0_i32_0 = arith.constant 0 : i32
    %c0_i32_1 = arith.constant 0 : i32
    %c0_i32_2 = arith.constant 0 : i32
    return %c0_i32, %c0_i32_0, %c0_i32_1 : i32, i32, i32
  }
  func.func @transform_8(%arg0: i32) -> (i32, i32, i32) {
    %c0_i32 = arith.constant 0 : i32
    %c0_i32_0 = arith.constant 0 : i32
    %c0_i32_1 = arith.constant 0 : i32
    %c0_i32_2 = arith.constant 0 : i32
    return %c0_i32, %c0_i32_0, %c0_i32_1 : i32, i32, i32
  }
  func.func @transform_9(%arg0: i32) -> (i32, i32) {
    %c0_i32 = arith.constant 0 : i32
    %c0_i32_0 = arith.constant 0 : i32
    %c0_i32_1 = arith.constant 0 : i32
    return %c0_i32, %c0_i32_0 : i32, i32
  }
  func.func @transform_10(%arg0: i32) -> (i32, i32) {
    %c0_i32 = arith.constant 0 : i32
    %c0_i32_0 = arith.constant 0 : i32
    %c0_i32_1 = arith.constant 0 : i32
    return %c0_i32, %c0_i32_0 : i32, i32
  }
  func.func @transform_11(%arg0: i32) -> (i32, i32) {
    %c0_i32 = arith.constant 0 : i32
    %c0_i32_0 = arith.constant 0 : i32
    %c0_i32_1 = arith.constant 0 : i32
    return %c0_i32, %c0_i32_0 : i32, i32
  }
  func.func @transform_12(%arg0: i32) -> (i32, i32) {
    %c0_i32 = arith.constant 0 : i32
    %c0_i32_0 = arith.constant 0 : i32
    %c0_i32_1 = arith.constant 0 : i32
    return %c0_i32, %c0_i32_0 : i32, i32
  }
  func.func @transform_13(%arg0: i32) -> (i32, i32) {
    %c0_i32 = arith.constant 0 : i32
    %c0_i32_0 = arith.constant 0 : i32
    %c0_i32_1 = arith.constant 0 : i32
    return %c0_i32, %c0_i32_0 : i32, i32
  }
  func.func @transform_14(%arg0: i32) -> (i32, i32) {
    %c0_i32 = arith.constant 0 : i32
    %c0_i32_0 = arith.constant 0 : i32
    %c0_i32_1 = arith.constant 0 : i32
    return %c0_i32, %c0_i32_0 : i32, i32
  }
  func.func @transform_15(%arg0: i32) -> (i32, i32) {
    %c0_i32 = arith.constant 0 : i32
    %c0_i32_0 = arith.constant 0 : i32
    %c0_i32_1 = arith.constant 0 : i32
    return %c0_i32, %c0_i32_0 : i32, i32
  }
  func.func @transform_16(%arg0: i32) -> (i32, i32) {
    %c0_i32 = arith.constant 0 : i32
    %c0_i32_0 = arith.constant 0 : i32
    %c0_i32_1 = arith.constant 0 : i32
    return %c0_i32, %c0_i32_0 : i32, i32
  }
  func.func @transform_17(%arg0: i32) -> (i32, i32, i32) {
    %c0_i32 = arith.constant 0 : i32
    %c0_i32_0 = arith.constant 0 : i32
    %c0_i32_1 = arith.constant 0 : i32
    return %arg0, %c0_i32, %c0_i32_0 : i32, i32, i32
  }
}

</mosaic_0001>

<bundles_post_ra>
// kernel: tpu_custom_call.1
= control target key start
LH: loop header
LB: loop body
LE: loop exit
PB: predicated region body
PF: predicated region fallthrough
CT: control target
= control target key end

     0   :  { %s1780_s24 = smov 0   ;;  %s2150_s0 = inlined_call_operand.vmem [shape: f32[2,32,16], index: 0, kind: input, shape index: {}]   ;;  %s2151_s1 = inlined_call_operand.vmem [shape: f32[32,32], index: 1, kind: input, shape index: {}]   ;;  %s2152_s2 = inlined_call_operand.vmem [shape: f32[32,1], index: 2, kind: input, shape index: {}]   ;;  %s2153_s3 = inlined_call_operand.vmem [shape: f32[32,1], index: 3, kind: input, shape index: {}]   ;;  %s2154_s4 = inlined_call_operand.vmem [shape: f32[32,1], index: 4, kind: input, shape index: {}]   ;;  %s2155_s5 = inlined_call_operand.vmem [shape: f32[3,8,24], index: 5, kind: input, shape index: {}]   ;;  %s2156_s6 = inlined_call_operand.vmem [shape: f32[3,8,1], index: 6, kind: input, shape index: {}]   ;;  %s2157_s7 = inlined_call_operand.vmem [shape: f32[3,8,1], index: 7, kind: input, shape index: {}]   ;;  %s2158_s8 = inlined_call_operand.vmem [shape: f32[3,8,1], index: 8, kind: input, shape index: {}]   ;;  %s2159_s9 = inlined_call_operand.vmem [shape: f32[32,32], index: 9, kind: input, shape index: {}]   ;;  %s2160_s10 = inlined_call_operand.vmem [shape: f32[32,1], index: 10, kind: input, shape index: {}]   ;;  %s2161_s11 = inlined_call_operand.vmem [shape: f32[32,1], index: 11, kind: input, shape index: {}]   ;;  %s2162_s12 = inlined_call_operand.vmem [shape: f32[32,1], index: 12, kind: input, shape index: {}]   ;;  %s2163_s13 = inlined_call_operand.vmem [shape: f32[128,32], index: 13, kind: input, shape index: {}]   ;;  %s2164_s14 = inlined_call_operand.vmem [shape: f32[128,1], index: 14, kind: input, shape index: {}]   ;;  %s2165_s15 = inlined_call_operand.vmem [shape: f32[32,128], index: 15, kind: input, shape index: {}]   ;;  %s2166_s16 = inlined_call_operand.vmem [shape: f32[32,1], index: 16, kind: input, shape index: {}]   ;;  %s2167_s17 = inlined_call_operand.vmem [shape: f32[2,32,16], index: 17, kind: output, shape index: {}]  }
   0x1   :  { %2169 = sst [smem:[#allocation2_spill]] %s2150_s0 }
   0x2   :  { %2170 = sst [smem:[#allocation3_spill]] %s2151_s1 }
   0x3 LB: > { %s1567_s25 = sadd.s32 4294967295, %s1685_s24   ;;  %p1571_p0 = scmp.ge.s32.totalorder %s1685_s24, 1  ;;  %s1685_s24 = sphi %s1780_s24, %s27_s24  }
   0x4   : > { %p487_p1 = scmp.lt.s32.totalorder %s1685_s24, 3 }
   0x6   : > { %p488_p2 = pnand %p1571_p0, %p487_p1 }
   0x7   : > { %p539_p3 = scmp.lt.s32.totalorder (!%p488_p2), %s1567_s25, 1  ;;  %s2171_s20 = sld [smem:[#allocation2_spill]] (!%p488_p2) }
   0x8   : > { %491 = sbr.rel (%p488_p2) target bundleno = 1684 (0x694), region = 88  ;;  %s2172_s19 = sld [smem:[#allocation3_spill]] (!%p488_p2) }
   0xd   : > { %v655_v0 = vld [vmem:[%s2154_s4] sm:$0xff]  ;;  %v1687_v2 = vmov 0   ;;  %s2174_s25 = smov (!%p539_p3, %s1567_s25), 1  ;;  %v558_v6 = vld [vmem:[%s2152_s2 + $0x8] sm:$0xff]  ;;  %vm581_vm0 = vcmask 261120   ;;  %v559_v17 = vld [vmem:[%s2152_s2 + $0x10] sm:$0xff]  ;;  %v683_v37 = vlaneseq }
   0xe   : > { %v557_v1 = vld [vmem:[%s2152_s2] sm:$0xff]  ;;  %1657 = vset.pattern.permute.xlu1 %v1687_v2  ;;  %1656 = vset.pattern.permute.xlu0 %v1687_v2  ;;  %s1635_s0 = sshll.u32 %s2174_s25, 5  ;;  %v628_v10 = vld [vmem:[%s2153_s3 + $0x8] sm:$0xff]  ;;  %v629_v18 = vld [vmem:[%s2153_s3 + $0x10] sm:$0xff]  ;;  %v1688_v43 = vmov 1.0   ;;  %vm698_vm5 = vcmask 130048  }
   0xf   : > { %661 = vperm.xlu1 %1657, %v655_v0   ;;  %563 = vperm.xlu0 %1656, %v557_v1   ;;  %v743_v3 = vld [vmem:[%s2156_s6] sm:$0xff]  ;;  %s1805_s21 = scalar_lea.vmem %s2171_s20, %s1635_s0  ;;  %v656_v12 = vld [vmem:[%s2154_s4 + $0x8] sm:$0xff]  ;;  %v555_v19 = vld [vmem:[%s2172_s19 + $0x10] sm:$0xff]  ;;  %v684_v38 = vshrl.u32 %v683_v37, 7  ;;  %v687_v39 = vand.u32 127, %v683_v37  ;;  %vm749_vm6 = vcmask 195584   ;;  %s2130_s28 = scalar_lea.vmem %s2167_s17, %s1635_s0 }
  0x10   : > { %1658 = vset.pattern.permute.xlu2 %v1687_v2  ;;  %v552_v4 = vld [vmem:[%s1805_s21 + $0x18] sm:$0xff]  ;;  %v551_v5 = vld [vmem:[%s1805_s21 + $0x10] sm:$0xff]  ;;  %v627_v7 = vld [vmem:[%s2153_s3] sm:$0xff] }
  0x11   : > { %746 = vperm.xlu2 %1658, %v743_v3   ;;  %606 = vmatpush.msra.mxu0 %v552_v4  ;;  %v1816_v8 = vld [vmem:[%s1805_s21 + $0x8] sm:$0xff]  ;;  %v1819_v9 = vld [vmem:[%s1805_s21] sm:$0xff]  ;;  %v657_v20 = vld [vmem:[%s2154_s4 + $0x10] sm:$0xff]  ;;  %v685_v40 = vadd.s32 8, %v684_v38  ;;  %v688_v41 = vadd.s32 4294967294, %v687_v39  ;;  %v693_v42 = vadd.s32 2, %v687_v39 }
  0x12   : > { %v553_v11 = vld [vmem:[%s2172_s19] sm:$0xff]  ;;  %v554_v15 = vld [vmem:[%s2172_s19 + $0x8] sm:$0xff]  ;;  %v556_v23 = vld [vmem:[%s2172_s19 + $0x18] sm:$0xff] }
  0x13   : > { %607 = vmatpush.msra.mxu0 %v551_v5  ;;  %v774_v13 = vld [vmem:[%s2157_s7] sm:$0xff]  ;;  %v1594_v16 = vld [vmem:[%s2156_s6 + $0x8] sm:$0xff]  ;;  %v1605_v24 = vld [vmem:[%s2156_s6 + $0x10] sm:$0xff]  ;;  %vm690_vm1 = vcmp.eq.s32.totalorder %v685_v40, %v688_v41  ;;  %vm695_vm2 = vcmp.eq.s32.totalorder %v685_v40, %v693_v42  ;;  %vm689_vm3 = vcmp.eq.s32.totalorder %v684_v38, %v688_v41  ;;  %vm694_vm4 = vcmp.eq.s32.totalorder %v684_v38, %v693_v42 }
  0x14   : > { %v781_v14 = vld [vmem:[%s2158_s8] sm:$0xff]  ;;  %v1596_v21 = vld [vmem:[%s2157_s7 + $0x8] sm:$0xff]  ;;  %v560_v25 = vld [vmem:[%s2152_s2 + $0x18] sm:$0xff]  ;;  %1580 = vmatpush.msk.msra.mxu1 %vm690_vm1, %v1688_v43  ;;  %1583 = vmatpush.msk.msra.mxu2 %vm695_vm2, %v1688_v43 }
  0x15   : > { %608 = vmatpush.msra.mxu0 %v1816_v8  ;;  %v1597_v22 = vld [vmem:[%s2158_s8 + $0x8] sm:$0xff]  ;;  %v630_v26 = vld [vmem:[%s2153_s3 + $0x18] sm:$0xff]  ;;  %v1607_v27 = vld [vmem:[%s2157_s7 + $0x10] sm:$0xff] }
  0x16   : > { %v658_v28 = vld [vmem:[%s2154_s4 + $0x18] sm:$0xff]  ;;  %v980_v29 = vld [vmem:[%s2160_s10 + $0x10] sm:$0xff]  ;;  %v978_v31 = vld [vmem:[%s2160_s10] sm:$0xff]  ;;  %1581 = vmatpush.msk.msra.mxu1 %vm689_vm3, %v1688_v43  ;;  %1584 = vmatpush.msk.msra.mxu2 %vm694_vm4, %v1688_v43 }
  0x17   : > { %568 = vperm.xlu1 %1657, %v558_v6   ;;  %633 = vperm.xlu0 %1656, %v627_v7   ;;  %v981_v30 = vld [vmem:[%s2160_s10 + $0x18] sm:$0xff]  ;;  %v1048_v33 = vld [vmem:[%s2161_s11 + $0x8] sm:$0xff]  ;;  %v1047_v36 = vld [vmem:[%s2161_s11] sm:$0xff] }
  0x18   : > { %609 = vmatpush.msra.mxu0 %v1819_v9  ;;  %v1050_v32 = vld [vmem:[%s2161_s11 + $0x18] sm:$0xff]  ;;  %v1076_v35 = vld [vmem:[%s2162_s12 + $0x8] sm:$0xff]  ;;  %1587 = vmatpush.msk.msrb.mxu1 %vm690_vm1, %v1688_v43  ;;  %v1608_v63 = vld [vmem:[%s2158_s8 + $0x10] sm:$0xff] }
  0x19   : > { %638 = vperm.xlu2 %1658, %v628_v10   ;;  %1576 = vmatmul.msk.f32.vlgmr.msra.gmra.mxu0 %vm581_vm0, %v553_v11  ;;  %v1078_v34 = vld [vmem:[%s2162_s12 + $0x18] sm:$0xff]  ;;  %v979_v0 = vld [vmem:[%s2160_s10 + $0x8] sm:$0xff]  ;;  %v1049_v1 = vld [vmem:[%s2161_s11 + $0x10] sm:$0xff] }
  0x1a   : > { %1590 = vmatpush.msk.msrb.mxu2 %vm695_vm2, %v1688_v43  ;;  %1588 = vmatpush.msk.msrb.mxu1 %vm689_vm3, %v1688_v43  ;;  %v1077_v2 = vld [vmem:[%s2162_s12 + $0x10] sm:$0xff]  ;;  %v1075_v4 = vld [vmem:[%s2162_s12] sm:$0xff] }
  0x1b   : > { %v742_v5 = vld [vmem:[%s2155_s5] sm:$0xff] }
  0x1c   : > { %1591 = vmatpush.msk.msrb.mxu2 %vm694_vm4, %v1688_v43 }
  0x1f   : > { %666 = vperm.xlu1 %1657, %v656_v12   ;;  %777 = vperm.xlu0 %1656, %v774_v13  }
  0x21   : > { %784 = vperm.xlu2 %1658, %v781_v14   ;;  %1577 = vmatmul.msk.f32.gmra.mxu0 %vm581_vm0, %v554_v15 }
  0x27   : > { %838 = vperm.xlu1 %1657, %v1594_v16   ;;  %573 = vperm.xlu0 %1656, %v559_v17  }
  0x29   : > { %643 = vperm.xlu2 %1658, %v629_v18   ;;  %1578 = vmatmul.msk.f32.gmra.mxu0 %vm581_vm0, %v555_v19 }
  0x2f   : > { %671 = vperm.xlu1 %1657, %v657_v20   ;;  %869 = vperm.xlu0 %1656, %v1596_v21  }
  0x31   : > { %877 = vperm.xlu2 %1658, %v1597_v22   ;;  %1579 = vmatmul.msk.f32.gmra.mxu0 %vm581_vm0, %v556_v23 }
  0x37   : > { %931 = vperm.xlu1 %1657, %v1605_v24   ;;  %578 = vperm.xlu0 %1656, %v560_v25  }
  0x39   : > { %648 = vperm.xlu2 %1658, %v630_v26  }
  0x3f   : > { %962 = vperm.xlu1 %1657, %v1607_v27   ;;  %676 = vperm.xlu0 %1656, %v658_v28  }
  0x41   : > { %970 = vperm.xlu2 %1658, %v1608_v63  }
  0x47   : > { %994 = vperm.xlu1 %1657, %v980_v29   ;;  %999 = vperm.xlu0 %1656, %v981_v30  }
  0x49   : > { %989 = vperm.xlu2 %1658, %v979_v0  }
  0x4f   : > { %984 = vperm.xlu1 %1657, %v978_v31   ;;  %1068 = vperm.xlu0 %1656, %v1050_v32   ;;  %v1593_v32 = vld [vmem:[%s2155_s5 + $0x8] sm:$0xff] }
  0x51   : > { %1063 = vperm.xlu2 %1658, %v1049_v1  }
  0x57   : > { %1058 = vperm.xlu1 %1657, %v1048_v33   ;;  %1096 = vperm.xlu0 %1656, %v1078_v34  }
  0x59   : > { %1091 = vperm.xlu2 %1658, %v1077_v2  }
  0x5f   : > { %1086 = vperm.xlu1 %1657, %v1076_v35   ;;  %1053 = vperm.xlu0 %1656, %v1047_v36  }
  0x61   : > { %1081 = vperm.xlu2 %1658, %v1075_v4  }
  0x6b   : > { %v747_v45 = vpop.permute.xlu2 %746 }
  0x73   : > { %v639_v47 = vpop.permute.xlu2 %638 }
  0x7b   : > { %v785_v56 = vpop.permute.xlu2 %784 }
  0x81   : > { %v564_v44 = vpop.permute.xlu0 %563  ;;  %v662_v52 = vpop.permute.xlu1 %661 }
  0x83   : > { %v644_v61 = vpop.permute.xlu2 %643 }
  0x89   : > { %v634_v46 = vpop.permute.xlu0 %633  ;;  %v569_v11 = vpop.permute.xlu1 %568 }
  0x8b   : > { %v878_v10 = vpop.permute.xlu2 %877 }
  0x91   : > { %v778_v53 = vpop.permute.xlu0 %777  ;;  %v667_v24 = vpop.permute.xlu1 %666 }
  0x93   : > { %v649_v21 = vpop.permute.xlu2 %648 }
  0x96   : > { %v611_v48 = vpop.f32.mrf.mxu0 }
  0x97   : > { %v612_v49 = vadd.f32 %v611_v48, %v564_v44  ;;  %v1604_v44 = vld [vmem:[%s2155_s5 + $0x10] sm:$0xff] }
  0x99   : > { %v623_v50 = vmax.f32 %v612_v49, 0.0  ;;  %v574_v57 = vpop.permute.xlu0 %573  ;;  %v839_v34 = vpop.permute.xlu1 %838 }
  0x9b   : > { %v651_v51 = vmul.f32 %v634_v46, %v623_v50 }
  0x9d   : > { %v679_v54 = vadd.f32 %v662_v52, %v651_v51  ;;  %v971_v52 = vpop.permute.xlu2 %970 }
  0x9e   : > { %v614_v55 = vpop.f32.mrf.mxu0 }
  0x9f   : > { %1582 = vmatmul.msk.f32.vlgmr.msra.gmra.mxu1 %vm698_vm5, %v679_v54  ;;  %1585 = vmatmul.msk.f32.vlgmr.msra.gmra.mxu2 %vm698_vm5, %v679_v54  ;;  %v615_v12 = vadd.f32 %v614_v55, %v569_v11  ;;  %v975_v55 = vld [vmem:[%s2159_s9 + $0x8] sm:$0xff] }
  0xa0   : > { %1598 = vmatpush.msk.msra.mxu1 %vm690_vm1, %v1688_v43  ;;  %1601 = vmatpush.msk.msra.mxu2 %vm695_vm2, %v1688_v43 }
  0xa1   : > { %v870_v7 = vpop.permute.xlu0 %869  ;;  %v624_v16 = vmax.f32 %v615_v12, 0.0  ;;  %v672_v39 = vpop.permute.xlu1 %671 }
  0xa2   : > { %1599 = vmatpush.msk.msra.mxu1 %vm689_vm3, %v1688_v43  ;;  %1602 = vmatpush.msk.msra.mxu2 %vm694_vm4, %v1688_v43 }
  0xa3   : > { %v652_v20 = vmul.f32 %v639_v47, %v624_v16 }
  0xa5   : > { %v680_v26 = vadd.f32 %v667_v24, %v652_v20 }
  0xa6   : > { %v617_v58 = vpop.f32.mrf.mxu0 }
  0xa7   : > { %v618_v59 = vadd.f32 %v617_v58, %v574_v57  ;;  %v977_v57 = vld [vmem:[%s2159_s9 + $0x18] sm:$0xff] }
  0xa9   : > { %v625_v60 = vmax.f32 %v618_v59, 0.0  ;;  %v579_v14 = vpop.permute.xlu0 %578  ;;  %v932_v46 = vpop.permute.xlu1 %931 }
  0xab   : > { %v653_v62 = vmul.f32 %v644_v61, %v625_v60  ;;  %v990_v60 = vpop.permute.xlu2 %989 }
  0xad   : > { %v681_v40 = vadd.f32 %v672_v39, %v653_v62  ;;  %v1150_v39 = vld [vmem:[%s2164_s14 + $0x40] sm:$0xff] }
  0xae   : > { %v620_v13 = vpop.f32.mrf.mxu0 }
  0xaf   : > { %v621_v15 = vadd.f32 %v620_v13, %v579_v14 }
  0xb1   : > { %v626_v19 = vmax.f32 %v621_v15, 0.0  ;;  %v677_v28 = vpop.permute.xlu0 %676  ;;  %v963_v50 = vpop.permute.xlu1 %962 }
  0xb3   : > { %v654_v25 = vmul.f32 %v649_v21, %v626_v19  ;;  %v1064_v63 = vpop.permute.xlu2 %1063 }
  0xb5   : > { %v682_v30 = vadd.f32 %v677_v28, %v654_v25 }
  0xb9   : > { %v995_v58 = vpop.permute.xlu1 %994  ;;  %v1000_v59 = vpop.permute.xlu0 %999 }
  0xc1   : > { %v985_v61 = vpop.permute.xlu1 %984  ;;  %v1069_v62 = vpop.permute.xlu0 %1068 }
  0xc9   : > { %v1059_v1 = vpop.permute.xlu1 %1058  ;;  %v1097_v2 = vpop.permute.xlu0 %1096 }
  0xd1   : > { %v1087_v12 = vpop.permute.xlu1 %1086  ;;  %v1054_v14 = vpop.permute.xlu0 %1053 }
 0x11c   : > { %v719_v6 = vpop.f32.mrf.mxu1 }
 0x122   : > { %v739_v3 = vpop.f32.mrf.mxu2 }
 0x123   : > { %766 = vmatpush.msra.mxu3 %v739_v3 }
 0x125   : > { %767 = vmatpush.msra.mxu3 %v679_v54  ;;  %v974_v54 = vld [vmem:[%s2159_s9] sm:$0xff] }
 0x127   : > { %768 = vmatpush.msra.mxu3 %v719_v6  ;;  %v1092_v6 = vpop.permute.xlu2 %1091 }
 0x128   : > { %1586 = vmatmul.msk.f32.vlgmr.msra.gmra.mxu3 %vm749_vm6, %v742_v5 }
 0x12f   : > { %v1082_v20 = vpop.permute.xlu2 %1081 }
 0x1ab   : > { %v770_v17 = vpop.f32.mrf.mxu3 }
 0x1ac   : > { %v771_v18 = vadd.f32 %v770_v17, %v747_v45 }
 0x1ae   : > { %v773_v22 = vmax.f32 %v771_v18, 0.0 }
 0x1b0   : > { %v780_v23 = vmul.f32 %v778_v53, %v773_v22 }
 0x1b2   : > { %v787_v27 = vadd.f32 %v785_v56, %v780_v23  ;;  %v976_v56 = vld [vmem:[%s2159_s9 + $0x10] sm:$0xff] }
 0x1b4   : > { %v788_v29 = vadd.f32 %v787_v27, %v680_v26 }
 0x1b6   : > { %1589 = vmatmul.msk.f32.vlgmr.msrb.gmra.mxu1 %vm698_vm5, %v788_v29  ;;  %1592 = vmatmul.msk.f32.vlgmr.msrb.gmra.mxu2 %vm698_vm5, %v788_v29 }
 0x1b7   : > { %1026 = vmatpush.msrb.mxu1 %v682_v30 }
 0x233   : > { %v809_v33 = vpop.f32.mrf.mxu1 }
 0x239   : > { %v829_v31 = vpop.f32.mrf.mxu2 }
 0x23a   : > { %857 = vmatpush.msrb.mxu3 %v829_v31 }
 0x23c   : > { %858 = vmatpush.msrb.mxu3 %v788_v29 }
 0x23e   : > { %859 = vmatpush.msrb.mxu3 %v809_v33  ;;  %v1156_v33 = vld [vmem:[%s2164_s14 + $0x70] sm:$0xff] }
 0x23f   : > { %1595 = vmatmul.msk.f32.vlgmr.msrb.gmra.mxu3 %vm749_vm6, %v1593_v32  ;;  %v1155_v32 = vld [vmem:[%s2164_s14 + $0x68] sm:$0xff] }
 0x2c2   : > { %v861_v35 = vpop.f32.mrf.mxu3 }
 0x2c3   : > { %v862_v36 = vadd.f32 %v861_v35, %v839_v34  ;;  %v1157_v34 = vld [vmem:[%s2164_s14 + $0x78] sm:$0xff]  ;;  %v1151_v35 = vld [vmem:[%s2164_s14 + $0x48] sm:$0xff] }
 0x2c5   : > { %v864_v37 = vmax.f32 %v862_v36, 0.0  ;;  %v1153_v36 = vld [vmem:[%s2164_s14 + $0x58] sm:$0xff] }
 0x2c7   : > { %v872_v38 = vmul.f32 %v870_v7, %v864_v37  ;;  %v1154_v37 = vld [vmem:[%s2164_s14 + $0x60] sm:$0xff] }
 0x2c9   : > { %v880_v41 = vadd.f32 %v878_v10, %v872_v38  ;;  %v1148_v38 = vld [vmem:[%s2164_s14 + $0x30] sm:$0xff] }
 0x2cb   : > { %v881_v42 = vadd.f32 %v880_v41, %v681_v40  ;;  %v1152_v40 = vld [vmem:[%s2164_s14 + $0x50] sm:$0xff] }
 0x2cd   : > { %1600 = vmatmul.msk.f32.vlgmr.msra.gmra.mxu1 %vm698_vm5, %v881_v42  ;;  %1603 = vmatmul.msk.f32.vlgmr.msra.gmra.mxu2 %vm698_vm5, %v881_v42 }
 0x34a   : > { %v902_v45 = vpop.f32.mrf.mxu1 }
 0x350   : > { %v922_v43 = vpop.f32.mrf.mxu2 }
 0x351   : > { %950 = vmatpush.msra.mxu3 %v922_v43  ;;  %v1149_v43 = vld [vmem:[%s2164_s14 + $0x38] sm:$0xff] }
 0x353   : > { %951 = vmatpush.msra.mxu3 %v881_v42  ;;  %v1147_v42 = vld [vmem:[%s2164_s14 + $0x28] sm:$0xff] }
 0x355   : > { %952 = vmatpush.msra.mxu3 %v902_v45  ;;  %v1144_v45 = vld [vmem:[%s2164_s14 + $0x10] sm:$0xff] }
 0x356   : > { %1606 = vmatmul.msk.f32.vlgmr.msra.gmra.mxu3 %vm749_vm6, %v1604_v44  ;;  %v1142_v44 = vld [vmem:[%s2164_s14] sm:$0xff] }
 0x3d9   : > { %v954_v47 = vpop.f32.mrf.mxu3 }
 0x3da   : > { %v955_v48 = vadd.f32 %v954_v47, %v932_v46  ;;  %v1146_v46 = vld [vmem:[%s2164_s14 + $0x20] sm:$0xff]  ;;  %v1373_v47 = vld [vmem:[%s2166_s16 + $0x10] sm:$0xff] }
 0x3dc   : > { %v957_v49 = vmax.f32 %v955_v48, 0.0  ;;  %v1371_v48 = vld [vmem:[%s2166_s16] sm:$0xff] }
 0x3de   : > { %v965_v51 = vmul.f32 %v963_v50, %v957_v49  ;;  %v1143_v49 = vld [vmem:[%s2164_s14 + $0x8] sm:$0xff]  ;;  %v1374_v50 = vld [vmem:[%s2166_s16 + $0x18] sm:$0xff] }
 0x3e0   : > { %v973_v53 = vadd.f32 %v971_v52, %v965_v51  ;;  %v1372_v51 = vld [vmem:[%s2166_s16 + $0x8] sm:$0xff]  ;;  %v1689_v52 = vmov 16.0  }
 0x3e1   : > { %1659 = vrcp.f32 %v1689_v52 }
 0x3e2   : > { %1027 = vmatpush.msrb.mxu1 %v973_v53 }
 0x3e4   : > { %1028 = vmatpush.msrb.mxu1 %v880_v41  ;;  %v1145_v41 = vld [vmem:[%s2164_s14 + $0x18] sm:$0xff] }
 0x3e6   : > { %1029 = vmatpush.msrb.mxu1 %v787_v27 }
 0x3e7   : > { %1609 = vmatmul.msk.f32.vlgmr.msrb.gmra.mxu1 %vm581_vm0, %v974_v54  ;;  %v1660_v53 = vpop.eup %1659 }
 0x3e8   : > { %v1116_v54 = vmul.f32 16.0, %v1660_v53  ;;  %vm1120_vm7 = vweird.f32 %v1660_v53 }
 0x3ef   : > { %1610 = vmatmul.msk.f32.gmra.mxu1 %vm581_vm0, %v975_v55  ;;  %v1117_v55 = vsub.f32 1.0, %v1116_v54 }
 0x3f7   : > { %1611 = vmatmul.msk.f32.gmra.mxu1 %vm581_vm0, %v976_v56  ;;  %v1118_v56 = vmul.f32 %v1660_v53, %v1117_v55 }
 0x3ff   : > { %1612 = vmatmul.msk.f32.gmra.mxu1 %vm581_vm0, %v977_v57 }
 0x464   : > { %v1031_v0 = vpop.f32.mrf.mxu1 }
 0x465   : > { %v1032_v4 = vadd.f32 %v1031_v0, %v985_v61 }
 0x467   : > { %v1043_v10 = vmax.f32 %v1032_v4, 0.0  ;;  %v1128_v4 = vld [vmem:[%s2163_s13 + $0x10] sm:$0xff] }
 0x469   : > { %v1071_v16 = vmul.f32 %v1054_v14, %v1043_v10  ;;  %v1136_v10 = vld [vmem:[%s2163_s13 + $0x50] sm:$0xff]  ;;  %v1131_v14 = vld [vmem:[%s2163_s13 + $0x28] sm:$0xff] }
 0x46b   : > { %v1973_v22 = vadd.f32 %v1082_v20, %v1071_v16  ;;  %v1132_v16 = vld [vmem:[%s2163_s13 + $0x30] sm:$0xff]  ;;  %v1134_v20 = vld [vmem:[%s2163_s13 + $0x40] sm:$0xff] }
 0x46c   : > { %v1034_v3 = vpop.f32.mrf.mxu1 }
 0x46d   : > { %v1035_v5 = vadd.f32 %v1034_v3, %v990_v60  ;;  %v1103_v27 = vsel %vm698_vm5, %v1973_v22, 0.0  ;;  %v1126_v3 = vld [vmem:[%s2163_s13] sm:$0xff] }
 0x46f   : > { %v1044_v7 = vmax.f32 %v1035_v5, 0.0  ;;  %v1135_v5 = vld [vmem:[%s2163_s13 + $0x48] sm:$0xff] }
 0x471   : > { %v1072_v11 = vmul.f32 %v1059_v1, %v1044_v7  ;;  %v1129_v7 = vld [vmem:[%s2163_s13 + $0x18] sm:$0xff] }
 0x473   : > { %v1969_v13 = vadd.f32 %v1087_v12, %v1072_v11  ;;  %v1130_v11 = vld [vmem:[%s2163_s13 + $0x20] sm:$0xff]  ;;  %v1137_v12 = vld [vmem:[%s2163_s13 + $0x58] sm:$0xff] }
 0x474   : > { %v1037_v15 = vpop.f32.mrf.mxu1 }
 0x475   : > { %v1038_v17 = vadd.f32 %v1037_v15, %v995_v58  ;;  %v1106_v18 = vsel %vm698_vm5, %v1969_v13, 0.0  ;;  %v1119_v58 = vadd.f32 %v1660_v53, %v1118_v56  ;;  %v1138_v15 = vld [vmem:[%s2163_s13 + $0x60] sm:$0xff] }
 0x476   : > { %1107 = vadd.xlane.f32.xlu2 %v1106_v18  ;;  %v1133_v18 = vld [vmem:[%s2163_s13 + $0x38] sm:$0xff] }
 0x477   : > { %v1045_v19 = vmax.f32 %v1038_v17, 0.0  ;;  %v1139_v17 = vld [vmem:[%s2163_s13 + $0x68] sm:$0xff] }
 0x479   : > { %v1073_v21 = vmul.f32 %v1064_v63, %v1045_v19  ;;  %v1140_v19 = vld [vmem:[%s2163_s13 + $0x70] sm:$0xff] }
 0x47b   : > { %v1975_v23 = vadd.f32 %v1092_v6, %v1073_v21  ;;  %v1127_v6 = vld [vmem:[%s2163_s13 + $0x8] sm:$0xff]  ;;  %v1141_v21 = vld [vmem:[%s2163_s13 + $0x78] sm:$0xff] }
 0x47c   : > { %v1040_v24 = vpop.f32.mrf.mxu1 }
 0x47d   : > { %v1041_v25 = vadd.f32 %v1040_v24, %v1000_v59  ;;  %v1109_v26 = vsel %vm698_vm5, %v1975_v23, 0.0  ;;  %v1121_v59 = vsel %vm1120_vm7, %v1660_v53, %v1119_v58 }
 0x47e   : > { %1110 = vadd.xlane.f32.xlu1 %v1109_v26  ;;  %1104 = vadd.xlane.f32.xlu2 %v1103_v27 }
 0x47f   : > { %v1046_v28 = vmax.f32 %v1041_v25, 0.0 }
 0x481   : > { %v1074_v29 = vmul.f32 %v1069_v62, %v1046_v28 }
 0x483   : > { %v1981_v30 = vadd.f32 %v1097_v2, %v1074_v29 }
 0x485   : > { %v1112_v31 = vsel %vm698_vm5, %v1981_v30, 0.0 }
 0x486   : > { %1113 = vadd.xlane.f32.xlu0 %v1112_v31 }
 0x496   : > { %1225 = vperm.xlu2 %1658, %v1155_v32  }
 0x497   : > { %1230 = vperm.xlu1 %1657, %v1156_v33  }
 0x49a   : > { %1235 = vperm.xlu0 %1656, %v1157_v34  }
 0x49e   : > { %1205 = vperm.xlu2 %1658, %v1151_v35  }
 0x49f   : > { %1215 = vperm.xlu1 %1657, %v1153_v36  }
 0x4a2   : > { %1220 = vperm.xlu0 %1656, %v1154_v37  }
 0x4a6   : > { %1190 = vperm.xlu2 %1658, %v1148_v38  }
 0x4a7   : > { %1200 = vperm.xlu1 %1657, %v1150_v39  }
 0x4aa   : > { %1210 = vperm.xlu0 %1656, %v1152_v40  }
 0x4ae   : > { %1175 = vperm.xlu2 %1658, %v1145_v41  }
 0x4af   : > { %1185 = vperm.xlu1 %1657, %v1147_v42  }
 0x4b2   : > { %1195 = vperm.xlu0 %1656, %v1149_v43  }
 0x4b6   : > { %1160 = vperm.xlu2 %1658, %v1142_v44  }
 0x4b7   : > { %1170 = vperm.xlu1 %1657, %v1144_v45  }
 0x4ba   : > { %1180 = vperm.xlu0 %1656, %v1146_v46  }
 0x4be   : > { %1387 = vperm.xlu2 %1658, %v1373_v47  }
 0x4bf   : > { %1377 = vperm.xlu1 %1657, %v1371_v48  }
 0x4c2   : > { %1165 = vperm.xlu0 %1656, %v1143_v49  }
 0x4c7   : > { %1392 = vperm.xlu1 %1657, %v1374_v50  }
 0x4ca   : > { %1382 = vperm.xlu0 %1656, %v1372_v51  }
 0x4e9   : > { %v1108_v57 = vpop.xlane.xlu2 %1107 }
 0x4ea   : > { %v1123_v1 = vmul.f32 %v1121_v59, %v1108_v57 }
 0x4f1   : > { %v1111_v60 = vpop.xlane.xlu1 %1110  ;;  %v1105_v0 = vpop.xlane.xlu2 %1104 }
 0x4f2   : > { %v1124_v63 = vmul.f32 %v1121_v59, %v1111_v60  ;;  %v1122_v2 = vmul.f32 %v1121_v59, %v1105_v0 }
 0x4f9   : > { %v1114_v61 = vpop.xlane.xlu0 %1113  ;;  %v1226_v37 = vpop.permute.xlu2 %1225 }
 0x4fa   : > { %v1125_v62 = vmul.f32 %v1121_v59, %v1114_v61 }
 0x4fc   : > { %1298 = vmatpush.msra.mxu1 %v1125_v62  ;;  %1637 = vmatpush.msrb.mxu2 %v1125_v62 }
 0x4fd   : > { %1638 = vmatpush.msrb.mxu3 %v1125_v62 }
 0x4fe   : > { %1299 = vmatpush.msra.mxu1 %v1124_v63  ;;  %1639 = vmatpush.msrb.mxu2 %v1124_v63 }
 0x4ff   : > { %1640 = vmatpush.msrb.mxu3 %v1124_v63 }
 0x500   : > { %1300 = vmatpush.msra.mxu1 %v1123_v1  ;;  %1641 = vmatpush.msrb.mxu2 %v1123_v1 }
 0x501   : > { %1642 = vmatpush.msrb.mxu3 %v1123_v1  ;;  %v1206_v42 = vpop.permute.xlu2 %1205 }
 0x502   : > { %1301 = vmatpush.msra.mxu1 %v1122_v2  ;;  %1643 = vmatpush.msrb.mxu2 %v1122_v2 }
 0x503   : > { %1644 = vmatpush.msrb.mxu3 %v1122_v2  ;;  %1613 = vmatmul.msk.f32.vlgmr.msra.gmra.mxu1 %vm581_vm0, %v1126_v3 }
 0x504   : > { %1615 = vmatmul.msk.f32.vlgmr.msrb.gmra.mxu2 %vm581_vm0, %v1128_v4  ;;  %1622 = vmatmul.msk.f32.vlgmr.msrb.gmra.mxu3 %vm581_vm0, %v1135_v5 }
 0x509   : > { %v1231_v34 = vpop.permute.xlu1 %1230  ;;  %v1191_v55 = vpop.permute.xlu2 %1190 }
 0x50b   : > { %1614 = vmatmul.msk.f32.gmra.mxu1 %vm581_vm0, %v1127_v6 }
 0x50c   : > { %1616 = vmatmul.msk.f32.gmra.mxu2 %vm581_vm0, %v1129_v7  ;;  %1623 = vmatmul.msk.f32.gmra.mxu3 %vm581_vm0, %v1136_v10  ;;  %v1236_v31 = vpop.permute.xlu0 %1235 }
 0x511   : > { %v1216_v40 = vpop.permute.xlu1 %1215  ;;  %v1176_v6 = vpop.permute.xlu2 %1175 }
 0x514   : > { %1617 = vmatmul.msk.f32.gmra.mxu2 %vm581_vm0, %v1130_v11  ;;  %1624 = vmatmul.msk.f32.gmra.mxu3 %vm581_vm0, %v1137_v12  ;;  %v1221_v36 = vpop.permute.xlu0 %1220 }
 0x519   : > { %v1201_v49 = vpop.permute.xlu1 %1200 }
 0x51c   : > { %1618 = vmatmul.msk.f32.gmra.mxu2 %vm581_vm0, %v1131_v14  ;;  %1625 = vmatmul.msk.f32.gmra.mxu3 %vm581_vm0, %v1138_v15  ;;  %v1211_v41 = vpop.permute.xlu0 %1210 }
 0x521   : > { %v1186_v63 = vpop.permute.xlu1 %1185 }
 0x524   : > { %1619 = vmatmul.msk.f32.gmra.mxu2 %vm581_vm0, %v1132_v16  ;;  %1626 = vmatmul.msk.f32.gmra.mxu3 %vm581_vm0, %v1139_v17  ;;  %v1196_v52 = vpop.permute.xlu0 %1195 }
 0x529   : > { %v1171_v16 = vpop.permute.xlu1 %1170 }
 0x52c   : > { %1620 = vmatmul.msk.f32.gmra.mxu2 %vm581_vm0, %v1133_v18  ;;  %1627 = vmatmul.msk.f32.gmra.mxu3 %vm581_vm0, %v1140_v19  ;;  %v1181_v3 = vpop.permute.xlu0 %1180 }
 0x534   : > { %1621 = vmatmul.msk.f32.gmra.mxu2 %vm581_vm0, %v1134_v20  ;;  %1628 = vmatmul.msk.f32.gmra.mxu3 %vm581_vm0, %v1141_v21  ;;  %v1166_v20 = vpop.permute.xlu0 %1165 }
 0x580   : > { %v1303_v0 = vpop.f32.mrf.mxu1 }
 0x587   : > { %v2109_v24 = vpop.f32.mrf.mxu2  ;;  %v1330_v25 = vpop.f32.mrf.mxu3 }
 0x588   : > { %v1331_v59 = vadd.f32 %v1330_v25, %v1206_v42  ;;  %v1306_v17 = vpop.f32.mrf.mxu1  ;;  %v1310_v18 = vadd.f32 %v2109_v24, %v1171_v16  ;;  %v1368_v24 = vld [vmem:[%s2165_s15 + $0x8] sm:$0xff] }
 0x589   : > { %v1307_v21 = vadd.f32 %v1306_v17, %v1166_v20 }
 0x58a   : > { %v1360_v1 = vmax.f32 %v1331_v59, 0.0 }
 0x58f   : > { %v1312_v26 = vpop.f32.mrf.mxu2  ;;  %v1333_v27 = vpop.f32.mrf.mxu3 }
 0x590   : > { %v1334_v56 = vadd.f32 %v1333_v27, %v1211_v41  ;;  %v1313_v14 = vadd.f32 %v1312_v26, %v1176_v6  ;;  %v1161_v27 = vpop.permute.xlu2 %1160  ;;  %v1367_v26 = vld [vmem:[%s2165_s15] sm:$0xff] }
 0x592   : > { %v1361_v61 = vmax.f32 %v1334_v56, 0.0  ;;  %v1354_v25 = vmax.f32 %v1313_v14, 0.0 }
 0x597   : > { %v1336_v28 = vpop.f32.mrf.mxu3  ;;  %v1315_v29 = vpop.f32.mrf.mxu2 }
 0x598   : > { %v1337_v53 = vadd.f32 %v1336_v28, %v1216_v40  ;;  %v1316_v11 = vadd.f32 %v1315_v29, %v1181_v3  ;;  %v1304_v28 = vadd.f32 %v1303_v0, %v1161_v27  ;;  %v1352_v29 = vmax.f32 %v1307_v21, 0.0 }
 0x59a   : > { %v1362_v60 = vmax.f32 %v1337_v53, 0.0  ;;  %v1355_v19 = vmax.f32 %v1316_v11, 0.0 }
 0x59f   : > { %v1339_v32 = vpop.f32.mrf.mxu3  ;;  %v1318_v33 = vpop.f32.mrf.mxu2 }
 0x5a0   : > { %v1340_v50 = vadd.f32 %v1339_v32, %v1221_v36  ;;  %v1319_v7 = vadd.f32 %v1318_v33, %v1186_v63  ;;  %v1351_v32 = vmax.f32 %v1304_v28, 0.0  ;;  %v1369_v33 = vld [vmem:[%s2165_s15 + $0x10] sm:$0xff] }
 0x5a2   : > { %v1363_v57 = vmax.f32 %v1340_v50, 0.0  ;;  %v1356_v15 = vmax.f32 %v1319_v7, 0.0 }
 0x5a7   : > { %v1342_v35 = vpop.f32.mrf.mxu3  ;;  %v1321_v38 = vpop.f32.mrf.mxu2 }
 0x5a8   : > { %v1343_v47 = vadd.f32 %v1342_v35, %v1226_v37  ;;  %v1322_v4 = vadd.f32 %v1321_v38, %v1191_v55  ;;  %v1378_v35 = vpop.permute.xlu1 %1377 }
 0x5aa   : > { %v1364_v54 = vmax.f32 %v1343_v47, 0.0  ;;  %v1357_v12 = vmax.f32 %v1322_v4, 0.0 }
 0x5af   : > { %v1345_v39 = vpop.f32.mrf.mxu3  ;;  %v1324_v43 = vpop.f32.mrf.mxu2 }
 0x5b0   : > { %v1346_v45 = vadd.f32 %v1345_v39, %v1231_v34  ;;  %v1325_v2 = vadd.f32 %v1324_v43, %v1196_v52  ;;  %v1370_v34 = vld [vmem:[%s2165_s15 + $0x18] sm:$0xff]  ;;  %v1383_v39 = vpop.permute.xlu0 %1382 }
 0x5b2   : > { %v1365_v51 = vmax.f32 %v1346_v45, 0.0  ;;  %v1358_v10 = vmax.f32 %v1325_v2, 0.0  ;;  %v1388_v45 = vpop.permute.xlu2 %1387 }
 0x5b7   : > { %v1348_v44 = vpop.f32.mrf.mxu3  ;;  %v1327_v58 = vpop.f32.mrf.mxu2 }
 0x5b8   : > { %v1349_v46 = vadd.f32 %v1348_v44, %v1236_v31  ;;  %v1328_v62 = vadd.f32 %v1327_v58, %v1201_v49  ;;  %v1353_v31 = vmax.f32 %v1310_v18, 0.0 }
 0x5ba   : > { %v1366_v48 = vmax.f32 %v1349_v46, 0.0  ;;  %v1359_v5 = vmax.f32 %v1328_v62, 0.0 }
 0x5bc   : > { %1395 = vmatpush.msrb.mxu0 %v1366_v48 }
 0x5be   : > { %1396 = vmatpush.msrb.mxu0 %v1365_v51 }
 0x5c0   : > { %1397 = vmatpush.msrb.mxu0 %v1364_v54  ;;  %v1393_v54 = vpop.permute.xlu1 %1392 }
 0x5c2   : > { %1398 = vmatpush.msrb.mxu0 %v1363_v57 }
 0x5c4   : > { %1399 = vmatpush.msrb.mxu0 %v1362_v60 }
 0x5c6   : > { %1400 = vmatpush.msrb.mxu0 %v1361_v61 }
 0x5c8   : > { %1401 = vmatpush.msrb.mxu0 %v1360_v1 }
 0x5ca   : > { %1402 = vmatpush.msrb.mxu0 %v1359_v5 }
 0x5cc   : > { %1403 = vmatpush.msrb.mxu0 %v1358_v10 }
 0x5ce   : > { %1404 = vmatpush.msrb.mxu0 %v1357_v12 }
 0x5d0   : > { %1405 = vmatpush.msrb.mxu0 %v1356_v15 }
 0x5d2   : > { %1406 = vmatpush.msrb.mxu0 %v1355_v19 }
 0x5d4   : > { %1407 = vmatpush.msrb.mxu0 %v1354_v25 }
 0x5d6   : > { %1408 = vmatpush.msrb.mxu0 %v1353_v31 }
 0x5d8   : > { %1409 = vmatpush.msrb.mxu0 %v1352_v29 }
 0x5da   : > { %1410 = vmatpush.msrb.mxu0 %v1351_v32 }
 0x5db   : > { %1411 = vmatmul.f32.vlgmr.msrb.gmra.mxu0 %v1367_v26 }
 0x5e3   : > { %1414 = vmatmul.f32.gmra.mxu0 %v1368_v24 }
 0x5eb   : > { %1417 = vmatmul.f32.gmra.mxu0 %v1369_v33 }
 0x5f3   : > { %1420 = vmatmul.f32.gmra.mxu0 %v1370_v34 }
 0x658   : > { %v1412_v36 = vpop.f32.mrf.mxu0 }
 0x659   : > { %v1413_v37 = vadd.f32 %v1412_v36, %v1378_v35  ;;  %v1677_v36 = vld [vmem:[%s1805_s21 + $0x10] sm:$0xff] }
 0x65b   : > { %v1629_v38 = vmul.f32 -1.442695, %v1413_v37 }
 0x65d   : > { %1661 = vpow2.f32 %v1629_v38 }
 0x660   : > { %v1415_v40 = vpop.f32.mrf.mxu0 }
 0x661   : > { %v1416_v41 = vadd.f32 %v1415_v40, %v1383_v39 }
 0x663   : > { %v1662_v42 = vpop.eup %1661  ;;  %v1630_v43 = vmul.f32 -1.442695, %v1416_v41 }
 0x664   : > { %v1436_v44 = vadd.f32 1.0, %v1662_v42 }
 0x665   : > { %1663 = vpow2.f32 %v1630_v43 }
 0x666   : > { %1665 = vrcp.f32 %v1436_v44  ;;  %v1451_v55 = vand.u32 2147483648, %v1436_v44  ;;  %v1449_v58 = vand.u32 2147483647, %v1436_v44  ;;  %vm1445_vm9 = vweird.f32 %v1436_v44 }
 0x668   : > { %v1418_v46 = vpop.f32.mrf.mxu0  ;;  %v1452_v0 = vor.u32 1.1754944e-38, %v1451_v55  ;;  %vm1450_vm11 = vcmp.eq.f32.partialorder %v1449_v58, 8.507059e+37 }
 0x669   : > { %v1419_v47 = vadd.f32 %v1418_v46, %v1388_v45 }
 0x66b   : > { %v1664_v48 = vpop.eup %1663  ;;  %v1631_v49 = vmul.f32 -1.442695, %v1419_v47 }
 0x66c   : > { %v1666_v50 = vpop.eup %1665  ;;  %v1437_v51 = vadd.f32 1.0, %v1664_v48 }
 0x66d   : > { %v1441_v52 = vmul.f32 %v1666_v50, %v1436_v44  ;;  %1667 = vpow2.f32 %v1631_v49  ;;  %vm1446_vm8 = vweird.f32 %v1666_v50  ;;  %v1678_v44 = vld [vmem:[%s1805_s21 + $0x18] sm:$0xff] }
 0x66e   : > { %1669 = vrcp.f32 %v1437_v51  ;;  %vm1447_vm10 = vmor %vm1445_vm9, %vm1446_vm8  ;;  %v1466_v7 = vand.u32 2147483648, %v1437_v51  ;;  %v1464_v12 = vand.u32 2147483647, %v1437_v51  ;;  %vm1460_vm13 = vweird.f32 %v1437_v51 }
 0x66f   : > { %v1442_v53 = vsub.f32 1.0, %v1441_v52 }
 0x670   : > { %v1421_v56 = vpop.f32.mrf.mxu0  ;;  %v1467_v16 = vor.u32 1.1754944e-38, %v1466_v7  ;;  %vm1465_vm15 = vcmp.eq.f32.partialorder %v1464_v12, 8.507059e+37 }
 0x671   : > { %v1443_v57 = vmul.f32 %v1666_v50, %v1442_v53  ;;  %v1422_v59 = vadd.f32 %v1421_v56, %v1393_v54 }
 0x673   : > { %v1668_v60 = vpop.eup %1667  ;;  %v1444_v61 = vadd.f32 %v1666_v50, %v1443_v57  ;;  %v1632_v62 = vmul.f32 -1.442695, %v1422_v59 }
 0x674   : > { %v1670_v63 = vpop.eup %1669  ;;  %v1438_v1 = vadd.f32 1.0, %v1668_v60 }
 0x675   : > { %v1448_v2 = vsel %vm1447_vm10, %v1666_v50, %v1444_v61  ;;  %v1456_v3 = vmul.f32 %v1670_v63, %v1437_v51  ;;  %1671 = vpow2.f32 %v1632_v62  ;;  %vm1461_vm12 = vweird.f32 %v1670_v63 }
 0x676   : > { %v1453_v4 = vsel %vm1450_vm11, %v1452_v0, %v1448_v2  ;;  %1673 = vrcp.f32 %v1438_v1  ;;  %vm1462_vm14 = vmor %vm1460_vm13, %vm1461_vm12  ;;  %v1481_v25 = vand.u32 2147483648, %v1438_v1  ;;  %v1479_v31 = vand.u32 2147483647, %v1438_v1 }
 0x677   : > { %v1500_v5 = vmul.f32 %v1453_v4, %v1973_v22  ;;  %v1457_v6 = vsub.f32 1.0, %v1456_v3  ;;  %vm1475_vm1 = vweird.f32 %v1438_v1 }
 0x678   : > { %v1482_v26 = vor.u32 1.1754944e-38, %v1481_v25  ;;  %vm1480_vm3 = vcmp.eq.f32.partialorder %v1479_v31, 8.507059e+37 }
 0x679   : > { %v1504_v10 = vadd.f32 %v1500_v5, %v1819_v9  ;;  %v1458_v11 = vmul.f32 %v1670_v63, %v1457_v6 }
 0x67b   : > { %v1672_v14 = vpop.eup %1671  ;;  %1508 = vst.msk [vmem:[%s2130_s28] sm:$0xff] %vm698_vm5, %v1504_v10  ;;  %v1459_v15 = vadd.f32 %v1670_v63, %v1458_v11 }
 0x67c   : > { %v1674_v22 = vpop.eup %1673  ;;  %v1439_v17 = vadd.f32 1.0, %v1672_v14 }
 0x67d   : > { %v1463_v18 = vsel %vm1462_vm14, %v1670_v63, %v1459_v15  ;;  %v1471_v19 = vmul.f32 %v1674_v22, %v1438_v1  ;;  %vm1476_vm0 = vweird.f32 %v1674_v22 }
 0x67e   : > { %v1468_v20 = vsel %vm1465_vm15, %v1467_v16, %v1463_v18  ;;  %1675 = vrcp.f32 %v1439_v17  ;;  %vm1477_vm2 = vmor %vm1475_vm1, %vm1476_vm0  ;;  %v1494_v39 = vand.u32 2147483647, %v1439_v17  ;;  %vm1490_vm6 = vweird.f32 %v1439_v17 }
 0x67f   : > { %v1501_v9 = vmul.f32 %v1468_v20, %v1969_v13  ;;  %v1472_v21 = vsub.f32 1.0, %v1471_v19 }
 0x680   : > { %vm1495_vm8 = vcmp.eq.f32.partialorder %v1494_v39, 8.507059e+37 }
 0x681   : > { %v1505_v27 = vadd.f32 %v1501_v9, %v1816_v8  ;;  %v1473_v28 = vmul.f32 %v1674_v22, %v1472_v21  ;;  %v1496_v8 = vand.u32 2147483648, %v1439_v17 }
 0x683   : > { %1509 = vst.msk [vmem:[%s2130_s28 + $0x8] sm:$0xff] %vm698_vm5, %v1505_v27  ;;  %v1474_v29 = vadd.f32 %v1674_v22, %v1473_v28  ;;  %v1497_v41 = vor.u32 1.1754944e-38, %v1496_v8 }
 0x684   : > { %v1676_v32 = vpop.eup %1675 }
 0x685   : > { %v1478_v24 = vsel %vm1477_vm2, %v1674_v22, %v1474_v29  ;;  %v1486_v33 = vmul.f32 %v1676_v32, %v1439_v17  ;;  %vm1491_vm4 = vweird.f32 %v1676_v32 }
 0x686   : > { %v1483_v13 = vsel %vm1480_vm3, %v1482_v26, %v1478_v24  ;;  %vm1492_vm7 = vmor %vm1490_vm6, %vm1491_vm4 }
 0x687   : > { %v1502_v34 = vmul.f32 %v1483_v13, %v1975_v23  ;;  %v1487_v35 = vsub.f32 1.0, %v1486_v33 }
 0x689   : > { %v1506_v37 = vadd.f32 %v1677_v36, %v1502_v34  ;;  %v1488_v38 = vmul.f32 %v1676_v32, %v1487_v35 }
 0x68b   : > { %1510 = vst.msk [vmem:[%s2130_s28 + $0x10] sm:$0xff] %vm698_vm5, %v1506_v37  ;;  %v1489_v40 = vadd.f32 %v1676_v32, %v1488_v38 }
 0x68d   : > { %v1493_v42 = vsel %vm1492_vm7, %v1676_v32, %v1489_v40 }
 0x68e   : > { %v1498_v43 = vsel %vm1495_vm8, %v1497_v41, %v1493_v42 }
 0x68f   : > { %v1503_v23 = vmul.f32 %v1498_v43, %v1981_v30 }
 0x691   : > { %v1507_v45 = vadd.f32 %v1678_v44, %v1503_v23 }
 0x693   : > { %1511 = vst.msk [vmem:[%s2130_s28 + $0x18] sm:$0xff] %vm698_vm5, %v1507_v45 }
 0x694 PF: > { %s27_s24 = sadd.s32 1, %s1685_s24  }
 0x695   : > { %p24_p4 = scmp.ge.s32.totalorder %s27_s24, 4  }
 0x697   :  { %26 = sbr.rel (!%p24_p4) target bundleno = 3 (0x3), region = 126 }

</bundles_post_ra>
